<compile_context>
chip_gen: v7x
topology: tpu7x:2x2x1
jax: 0.10.0
libtpu: 0.0.40
codegen_flags: <defaults>
</compile_context>

<pallas_src>
import jax
import jax.numpy as jnp
from jax.experimental import pallas as pl
from jax.experimental.pallas import tpu as pltpu

IN_DIM, H1, H2, OUT_DIM = 784, 512, 256, 1
TB_MAX = 512          # max batch-tile rows
SMALL_B = 64          # below this: single block, no grid (overhead-bound)
VMEM_LIMIT = 32 << 20


def _round_up(n, m):
    return ((n + m - 1) // m) * m


def _disc_kernel(x_ref, w1_ref, b1_ref, w2_ref, b2_ref, w3_ref, b3_ref, o_ref):
    # In-kernel f32 -> bf16 cast (VPU has slack; avoids a separate XLA pass).
    x = x_ref[...].astype(jnp.bfloat16)                      # (TB, 784)

    # ---- Layer 1: Linear(784->512) + LeakyReLU(0.2)  (bf16 MXU, f32 acc) ----
    h = jnp.dot(x, w1_ref[...], preferred_element_type=jnp.float32)
    h = h + b1_ref[...]                                      # (TB, 512)
    h = jnp.where(h > 0, h, 0.2 * h)

    # ---- Layer 2: Linear(512->256) + LeakyReLU(0.2) ----
    h = jnp.dot(h.astype(jnp.bfloat16), w2_ref[...],
                preferred_element_type=jnp.float32)
    h = h + b2_ref[...]                                      # (TB, 256)
    h = jnp.where(h > 0, h, 0.2 * h)

    # ---- Layer 3: Linear(256->1) + Sigmoid, done on VPU + XLU reduce so the
    # output stays a compact (TB, 1) column (no 128-wide padding, no slice).
    logit = jnp.sum(h * w3_ref[...], axis=-1, keepdims=True) + b3_ref[...]
    o_ref[...] = jax.nn.sigmoid(logit)                       # (TB, 1) f32


def _cost_estimate(batch):
    flops = 2 * batch * (IN_DIM * H1 + H1 * H2 + H2 * OUT_DIM)
    weight_bytes = (IN_DIM * H1 + H1 * H2) * 2 + H2 * 4      # bf16 w1/w2, f32 w3
    bias_bytes = (H1 + H2 + OUT_DIM) * 4
    io_bytes = batch * IN_DIM * 4 + batch * OUT_DIM * 4
    return pl.CostEstimate(flops=flops, transcendentals=batch,
                           bytes_accessed=weight_bytes + bias_bytes + io_bytes)


def prepare_params(raw_params):
    """Cast raw (in, out) f32 params for the kernel.

    w1, w2 -> bf16 (MXU operands).  w3 is stored as a (1, 256) f32 row (it is
    consumed by a VPU multiply + reduce, not the MXU).  Biases stay f32.
    """
    w1, b1, w2, b2, w3, b3 = raw_params
    return (w1.astype(jnp.bfloat16), b1.astype(jnp.float32),
            w2.astype(jnp.bfloat16), b2.astype(jnp.float32),
            w3.T.astype(jnp.float32),                       # (1, 256)
            b3.astype(jnp.float32))                         # (1, 1)


def discriminator_forward(x, kernel_params):
    """x: (B, 1, 28, 28) or (B, 784) float32.  Returns (B, 1) float32."""
    w1, b1, w2, b2, w3, b3 = kernel_params
    B = x.shape[0]
    x_flat = x.reshape(B, -1).astype(jnp.float32)            # torch .view(B,-1)
    assert x_flat.shape[1] == IN_DIM

    cost = _cost_estimate(B)

    if B < SMALL_B:
        # Tiny-batch regime: launch/DMA-overhead bound; one block, no grid.
        full = lambda shape: pl.BlockSpec(shape, lambda: tuple(0 for _ in shape))
        return pl.pallas_call(
            _disc_kernel,
            out_shape=jax.ShapeDtypeStruct((B, OUT_DIM), jnp.float32),
            in_specs=[
                full((B, IN_DIM)),
                full((IN_DIM, H1)), full((1, H1)),
                full((H1, H2)),     full((1, H2)),
                full((1, H2)),      full((1, OUT_DIM)),
            ],
            out_specs=full((B, OUT_DIM)),
            compiler_params=pltpu.CompilerParams(vmem_limit_bytes=VMEM_LIMIT),
            cost_estimate=cost,
        )(x_flat, w1, b1, w2, b2, w3, b3)

    # Batch-tiled regime: >= 2 grid steps (both v7x TensorCores get work),
    # tiles capped at TB_MAX rows.  Weights stay resident (constant index_map).
    n_steps = max(2, pl.cdiv(B, TB_MAX))
    tb = _round_up(pl.cdiv(B, n_steps), 8)
    Bp = tb * n_steps
    if Bp != B:
        x_flat = jnp.pad(x_flat, ((0, Bp - B), (0, 0)))

    resident = lambda shape: pl.BlockSpec(shape, lambda i: (0, 0))
    out = pl.pallas_call(
        _disc_kernel,
        out_shape=jax.ShapeDtypeStruct((Bp, OUT_DIM), jnp.float32),
        grid=(n_steps,),
        in_specs=[
            pl.BlockSpec((tb, IN_DIM), lambda i: (i, 0)),
            resident((IN_DIM, H1)), resident((1, H1)),
            resident((H1, H2)),     resident((1, H2)),
            resident((1, H2)),      resident((1, OUT_DIM)),
        ],
        out_specs=pl.BlockSpec((tb, OUT_DIM), lambda i: (i, 0)),
        compiler_params=pltpu.CompilerParams(
            dimension_semantics=("parallel",),
            vmem_limit_bytes=VMEM_LIMIT),
        cost_estimate=cost,
    )(x_flat, w1, b1, w2, b2, w3, b3)
    return out[:B]


def init_raw_params(key):
    """Deterministic synthetic parameters, stored as (in, out) f32
    (transposed relative to torch's (out, in)), nn.Linear-style init."""
    ks = jax.random.split(key, 6)

    def linear(kw, kb, fan_in, fan_out):
        bound = 1.0 / jnp.sqrt(fan_in)
        w = jax.random.uniform(kw, (fan_in, fan_out), jnp.float32, -bound, bound)
        b = jax.random.uniform(kb, (1, fan_out), jnp.float32, -bound, bound)
        return w, b

    w1, b1 = linear(ks[0], ks[1], IN_DIM, H1)
    w2, b2 = linear(ks[2], ks[3], H1, H2)
    w3, b3 = linear(ks[4], ks[5], H2, OUT_DIM)
    return (w1, b1, w2, b2, w3, b3)


def _reference_forward_bf16(x, raw_params):
    """Pure-JAX reference matching the kernel's numerics (bf16 layers 1-2 with
    f32 accumulation, f32 final layer)."""
    w1, b1, w2, b2, w3, b3 = raw_params
    h = x.reshape(x.shape[0], -1).astype(jnp.bfloat16)
    h = jnp.dot(h, w1.astype(jnp.bfloat16),
                preferred_element_type=jnp.float32) + b1
    h = jnp.where(h > 0, h, 0.2 * h)
    h = jnp.dot(h.astype(jnp.bfloat16), w2.astype(jnp.bfloat16),
                preferred_element_type=jnp.float32) + b2
    h = jnp.where(h > 0, h, 0.2 * h)
    h = jnp.dot(h, w3, precision=jax.lax.Precision.HIGHEST) + b3
    return jax.nn.sigmoid(h)


def _reference_forward_f32(x, raw_params):
    w1, b1, w2, b2, w3, b3 = raw_params
    h = x.reshape(x.shape[0], -1)
    h = h @ w1 + b1
    h = jnp.where(h > 0, h, 0.2 * h)
    h = h @ w2 + b2
    h = jnp.where(h > 0, h, 0.2 * h)
    h = h @ w3 + b3
    return jax.nn.sigmoid(h)


if __name__ == "__main__":
    key = jax.random.PRNGKey(0)
    k_param, k_small, k_big = jax.random.split(key, 3)

    raw_params = init_raw_params(k_param)
    kernel_params = prepare_params(raw_params)

    # --- Small batch (single-block, no-grid path) ---
    x_small = jax.random.normal(k_small, (8, 1, 28, 28), dtype=jnp.float32)
    out_small = jax.block_until_ready(discriminator_forward(x_small, kernel_params))
    assert out_small.shape == (8, 1)
    ref_small = _reference_forward_bf16(x_small, raw_params)
    assert jnp.allclose(out_small, ref_small, atol=1e-3, rtol=1e-3)
    assert jnp.allclose(out_small, _reference_forward_f32(x_small, raw_params),
                        atol=3e-2)

    # --- Larger batch (batch-tiled, parallel-grid path: 2 steps of 128) ---
    x_big = jax.random.normal(k_big, (256, 784), dtype=jnp.float32)
    out_big = jax.block_until_ready(discriminator_forward(x_big, kernel_params))
    assert out_big.shape == (256, 1)
    ref_big = _reference_forward_bf16(x_big, raw_params)
    assert jnp.allclose(out_big, ref_big, atol=1e-3, rtol=1e-3)

    print("KERNEL_OK")
</pallas_src>

<mosaic_0001>
module attributes {stable_mosaic.version = 11 : i64} {
  func.func @_disc_kernel(%arg0: memref<8x784xf32, #tpu.memory_space<vmem>>, %arg1: memref<784x512xbf16, #tpu.memory_space<vmem>>, %arg2: memref<1x512xf32, #tpu.memory_space<vmem>>, %arg3: memref<512x256xbf16, #tpu.memory_space<vmem>>, %arg4: memref<1x256xf32, #tpu.memory_space<vmem>>, %arg5: memref<1x256xf32, #tpu.memory_space<vmem>>, %arg6: memref<1x1xf32, #tpu.memory_space<vmem>>, %arg7: memref<8x1xf32, #tpu.memory_space<vmem>>) attributes {dimension_semantics = [], scalar_prefetch = 0 : i64, scratch_operands = 0 : i64, tpu.core_type = #tpu.core_type<tc>} {
    %c0 = arith.constant 0 : index
    %c0_0 = arith.constant 0 : index
    %0 = vector.load %arg0[%c0, %c0_0] : memref<8x784xf32, #tpu.memory_space<vmem>>, vector<8x784xf32>
    %1 = arith.truncf %0 : vector<8x784xf32> to vector<8x784xbf16>
    %c0_1 = arith.constant 0 : index
    %c0_2 = arith.constant 0 : index
    %2 = vector.load %arg1[%c0_1, %c0_2] : memref<784x512xbf16, #tpu.memory_space<vmem>>, vector<784x512xbf16>
    %cst = arith.constant dense<0.000000e+00> : vector<8x512xf32>
    %3 = tpu.matmul %1, %2, %cst {dimension_numbers = #tpu.dot_dimension_numbers<[1], [0], [0], [1], [0, 0, 1, 1], [], []>} : vector<8x784xbf16>, vector<784x512xbf16>, vector<8x512xf32> -> vector<8x512xf32>
    %c0_3 = arith.constant 0 : index
    %c0_4 = arith.constant 0 : index
    %4 = vector.load %arg2[%c0_3, %c0_4] : memref<1x512xf32, #tpu.memory_space<vmem>>, vector<1x512xf32>
    %5 = vector.broadcast %4 : vector<1x512xf32> to vector<8x512xf32>
    %6 = arith.addf %3, %5 : vector<8x512xf32>
    %cst_5 = arith.constant 0.000000e+00 : f32
    %7 = vector.broadcast %cst_5 : f32 to vector<8x512xf32>
    %8 = arith.cmpf ogt, %6, %7 : vector<8x512xf32>
    %cst_6 = arith.constant 2.000000e-01 : f32
    %9 = vector.broadcast %cst_6 : f32 to vector<8x512xf32>
    %10 = arith.mulf %9, %6 : vector<8x512xf32>
    %11 = arith.select %8, %6, %10 : vector<8x512xi1>, vector<8x512xf32>
    %12 = arith.truncf %11 : vector<8x512xf32> to vector<8x512xbf16>
    %c0_7 = arith.constant 0 : index
    %c0_8 = arith.constant 0 : index
    %13 = vector.load %arg3[%c0_7, %c0_8] : memref<512x256xbf16, #tpu.memory_space<vmem>>, vector<512x256xbf16>
    %cst_9 = arith.constant dense<0.000000e+00> : vector<8x256xf32>
    %14 = tpu.matmul %12, %13, %cst_9 {dimension_numbers = #tpu.dot_dimension_numbers<[1], [0], [0], [1], [0, 0, 1, 1], [], []>} : vector<8x512xbf16>, vector<512x256xbf16>, vector<8x256xf32> -> vector<8x256xf32>
    %c0_10 = arith.constant 0 : index
    %c0_11 = arith.constant 0 : index
    %15 = vector.load %arg4[%c0_10, %c0_11] : memref<1x256xf32, #tpu.memory_space<vmem>>, vector<1x256xf32>
    %16 = vector.broadcast %15 : vector<1x256xf32> to vector<8x256xf32>
    %17 = arith.addf %14, %16 : vector<8x256xf32>
    %cst_12 = arith.constant 0.000000e+00 : f32
    %18 = vector.broadcast %cst_12 : f32 to vector<8x256xf32>
    %19 = arith.cmpf ogt, %17, %18 : vector<8x256xf32>
    %cst_13 = arith.constant 2.000000e-01 : f32
    %20 = vector.broadcast %cst_13 : f32 to vector<8x256xf32>
    %21 = arith.mulf %20, %17 : vector<8x256xf32>
    %22 = arith.select %19, %17, %21 : vector<8x256xi1>, vector<8x256xf32>
    %c0_14 = arith.constant 0 : index
    %c0_15 = arith.constant 0 : index
    %23 = vector.load %arg5[%c0_14, %c0_15] : memref<1x256xf32, #tpu.memory_space<vmem>>, vector<1x256xf32>
    %24 = vector.broadcast %23 : vector<1x256xf32> to vector<8x256xf32>
    %25 = arith.mulf %22, %24 : vector<8x256xf32>
    %cst_16 = arith.constant dense<0.000000e+00> : vector<8xf32>
    %26 = vector.multi_reduction <add>, %25, %cst_16 [1] : vector<8x256xf32> to vector<8xf32>
    %27 = vector.shape_cast %26 : vector<8xf32> to vector<8x1xf32>
    %c0_17 = arith.constant 0 : index
    %c0_18 = arith.constant 0 : index
    %28 = vector.load %arg6[%c0_17, %c0_18] : memref<1x1xf32, #tpu.memory_space<vmem>>, vector<1x1xf32>
    %29 = vector.broadcast %28 : vector<1x1xf32> to vector<8x1xf32>
    %30 = arith.addf %27, %29 : vector<8x1xf32>
    %31 = arith.negf %30 : vector<8x1xf32>
    %32 = math.exp %31 : vector<8x1xf32>
    %cst_19 = arith.constant 1.000000e+00 : f32
    %33 = vector.broadcast %cst_19 : f32 to vector<8x1xf32>
    %34 = arith.addf %33, %32 : vector<8x1xf32>
    %35 = arith.divf %33, %34 : vector<8x1xf32>
    %c0_20 = arith.constant 0 : index
    %c0_21 = arith.constant 0 : index
    %36 = vector.load %arg7[%c0_20, %c0_21] : memref<8x1xf32, #tpu.memory_space<vmem>>, vector<8x1xf32>
    tpu.vector_store %arg7[%c0_20, %c0_21], %35 {strides = array<i32>} : memref<8x1xf32, #tpu.memory_space<vmem>>, vector<8x1xf32>,
    return
  }
}

</mosaic_0001>

<bundles_post_ra>
// kernel: tpu_custom_call.1
= control target key start
LH: loop header
LB: loop body
LE: loop exit
PB: predicated region body
PF: predicated region fallthrough
CT: control target
= control target key end

     0   :  { %s3072_s0 = inlined_call_operand.hbm [shape: f32[8,784], index: 0, kind: input, shape index: {}]   ;;  %s3073_s1 = inlined_call_operand.hbm [shape: bf16[784,512], index: 1, kind: input, shape index: {}]   ;;  %s3074_s2 = inlined_call_operand.vmem [shape: f32[1,512], index: 2, kind: input, shape index: {}]   ;;  %s3075_s3 = inlined_call_operand.hbm [shape: bf16[512,256], index: 3, kind: input, shape index: {}]   ;;  %s3076_s4 = inlined_call_operand.vmem [shape: f32[1,256], index: 4, kind: input, shape index: {}]   ;;  %s3077_s5 = inlined_call_operand.vmem [shape: f32[1,256], index: 5, kind: input, shape index: {}]   ;;  %s3078_s6 = inlined_call_operand.<no memory space> [shape: f32[1,1], index: 6, kind: input, shape index: {}]   ;;  %s3079_s7 = inlined_call_operand.vmem [shape: f32[8,1], index: 7, kind: output, shape index: {}]  }
   0x1   :  { %v12_v0 = vstv %s3078_s6 }
   0x2   :  { %13 = vst [vmem:[#allocation2] sm:$0x1] %v12_v0 }
   0x3   :  { %14 = vsyncpa [#allocation4], 0 }
   0x4   :  { %15 = vsyncpa [#allocation6], 0  ;;  %s2919_s26 = smov [#allocation5]   ;;  %s2849_s30 = scalar_lea.hbm %s3073_s1, 25088 }
   0x5   :  { %s31_s27 = sshll.u32 %s2919_s26, 4  ;;  %p2850_p0 = scmp.ne.s32.totalorder %s3073_s1, %s2849_s30  ;;  %s32_s27 = int_to_ptr.vmem [resolvable:$true] %s31_s27 }
   0x6   :  { %p2853_p1 = scmp.lt.u32.totalorder %s2849_s30, %s3073_s1 }
   0x8   :  { %p2855_p2 = pnand %p2853_p1, %p2850_p0 }
   0xa   :  { %2858 = shalt.err (!%p2855_p2)
}
   0xb   :  { %s2859_s6 = scalar_lea.vmem %s32_s27, 25088  ;;  %p2864_p4 = scmp.lt.s32.totalorder %s32_s27, %s32_s27 }
   0xc   :  { %p2860_p3 = scmp.ne.s32.totalorder %s32_s27, %s2859_s6  ;;  %p2865_p5 = scmp.lt.s32.totalorder %s2859_s6, %s2859_s6 }
   0xe   :  { %p2866_p6 = por %p2865_p5, %p2864_p4 }
  0x10   :  { %p2867_p7 = pnand %p2866_p6, %p2860_p3 }
  0x12   :  { %2870 = shalt.err (!%p2867_p7)
}
  0x13   :  { %s2920_s12 = smov 256   ;;  %s2921_s13 = smov 16  }
  0x14   :  { %37 = dma.hbm_to_vmem [thread:$0]  %s3073_s1, 25088, %s32_s27, [#allocation6], %s2920_s12, %s2920_s12, %s2921_s13  }
  0x15   :  { %s2922_s16 = smov [#allocation3]   ;;  %s2923_s18 = smov [#allocation7]  }
  0x16   :  { %s22_s17 = sshll.u32 %s2922_s16, 4  ;;  %s45_s19 = sshll.u32 %s2923_s18, 4  ;;  %s23_s17 = int_to_ptr.vmem [resolvable:$true] %s22_s17  ;;  %s46_s19 = int_to_ptr.vmem [resolvable:$true] %s45_s19 }
  0x17   :  { %s2871_s22 = scalar_lea.hbm %s3072_s0, 896 }
  0x18   :  { %p2872_p8 = scmp.ne.s32.totalorder %s3072_s0, %s2871_s22  ;;  %p2875_p9 = scmp.lt.u32.totalorder %s2871_s22, %s3072_s0 }
  0x1a   :  { %p2877_p10 = pnand %p2875_p9, %p2872_p8 }
  0x1c   :  { %2880 = shalt.err (!%p2877_p10)
}
  0x1d   :  { %s2881_s1 = scalar_lea.vmem %s23_s17, 896  ;;  %p2886_p12 = scmp.lt.s32.totalorder %s23_s17, %s23_s17 }
  0x1e   :  { %p2882_p11 = scmp.ne.s32.totalorder %s23_s17, %s2881_s1  ;;  %p2887_p13 = scmp.lt.s32.totalorder %s2881_s1, %s2881_s1 }
  0x20   :  { %p2888_p0 = por %p2887_p13, %p2886_p12 }
  0x22   :  { %p2889_p1 = pnand %p2888_p0, %p2882_p11 }
  0x24   :  { %2892 = shalt.err (!%p2889_p1)
}
  0x25   :  { %25 = dma.hbm_to_vmem [thread:$0]  %s3072_s0, 896, %s23_s17, [#allocation4]  }
  0x26   :  { %s2893_s8 = scalar_lea.hbm %s3075_s3, 8192 }
  0x27   :  { %p2894_p2 = scmp.ne.s32.totalorder %s3075_s3, %s2893_s8  ;;  %p2897_p3 = scmp.lt.u32.totalorder %s2893_s8, %s3075_s3 }
  0x29   :  { %p2899_p4 = pnand %p2897_p3, %p2894_p2 }
  0x2b   :  { %2902 = shalt.err (!%p2899_p4)
}
  0x2c   :  { %s2903_s12 = scalar_lea.vmem %s46_s19, 8192  ;;  %p2908_p6 = scmp.lt.s32.totalorder %s46_s19, %s46_s19 }
  0x2d   :  { %p2904_p5 = scmp.ne.s32.totalorder %s46_s19, %s2903_s12  ;;  %p2909_p7 = scmp.lt.s32.totalorder %s2903_s12, %s2903_s12 }
  0x2f   :  { %p2910_p8 = por %p2909_p7, %p2908_p6 }
  0x31   :  { %p2911_p9 = pnand %p2910_p8, %p2904_p5 }
  0x33   :  { %2914 = shalt.err (!%p2911_p9)
}
  0x34   :  { %s2924_s0 = smov 128   ;;  %s2925_s13 = smov 8  }
  0x35   :  { %51 = dma.hbm_to_vmem [thread:$0]  %s3075_s3, 8192, %s46_s19, [#allocation6], %s2924_s0, %s2924_s0, %s2925_s13  }
  0x36   :  { %2915 = dma.done.wait [#allocation4], 896  }
  0x37   :  { %2916 = vsyncadd [#allocation4], 4294966400 }
  0x38   :  { %2917 = dma.done.wait [#allocation6], 33280  }
  0x39   :  { %2918 = vsyncadd [#allocation6], 4294934016  ;;  %v2455_v1 = vld [vmem:[#allocation5 + $0x4] ss:$16 sps:$4 sm:$0xff]   ;;  %v2459_v3 = vld [vmem:[#allocation5] ss:$16 sps:$4 sm:$0xff]  }
  0x3a   :  { %v2457_v2 = vld [vmem:[#allocation5 + $0x204] ss:$16 sps:$4 sm:$0xff]   ;;  %1284 = vmatprep.subr.bf16.mxu1 %v2455_v1  ;;  %v2460_v4 = vld [vmem:[#allocation5 + $0x200] ss:$16 sps:$4 sm:$0xff]   ;;  %vm1280_vm0 = vcmask 130048   ;;  %vm2143_vm7 = vcmask 7168  }
  0x3b   :  { %1325 = vmatprep.subr.bf16.mxu0 %v2457_v2  ;;  %v2461_v5 = vld [vmem:[#allocation5 + $0x24] ss:$16 sps:$4 sm:$0xff]   ;;  %1285 = vmatpush1.bf16.msra.mxu1 %v2459_v3  ;;  %v2465_v7 = vld [vmem:[#allocation5 + $0x20] ss:$16 sps:$4 sm:$0xff]  }
  0x3c   :  { %1326 = vmatpush1.bf16.msra.mxu0 %v2460_v4  ;;  %v2463_v6 = vld [vmem:[#allocation5 + $0x224] ss:$16 sps:$4 sm:$0xff]   ;;  %1286 = vmatprep.subr.bf16.mxu1 %v2461_v5  ;;  %v2466_v8 = vld [vmem:[#allocation5 + $0x220] ss:$16 sps:$4 sm:$0xff]   ;;  %v68_v5 = vld [vmem:[#allocation3] sm:$0xff] }
  0x3d   :  { %1327 = vmatprep.subr.bf16.mxu0 %v2463_v6  ;;  %v2467_v9 = vld [vmem:[#allocation5 + $0x44] ss:$16 sps:$4 sm:$0xff]   ;;  %v2471_v11 = vld [vmem:[#allocation5 + $0x40] ss:$16 sps:$4 sm:$0xff]  }
  0x3e   :  { %v2469_v10 = vld [vmem:[#allocation5 + $0x244] ss:$16 sps:$4 sm:$0xff]   ;;  %v2472_v12 = vld [vmem:[#allocation5 + $0x240] ss:$16 sps:$4 sm:$0xff]  }
  0x3f   :  { %1287 = vmatpush1.bf16.msra.mxu1 %v2465_v7  ;;  %v2473_v13 = vld [vmem:[#allocation5 + $0x64] ss:$16 sps:$4 sm:$0xff]   ;;  %v2477_v15 = vld [vmem:[#allocation5 + $0x60] ss:$16 sps:$4 sm:$0xff]   ;;  %v70_v7 = vld [vmem:[#allocation3 + $0x10] sm:$0xff] }
  0x40   :  { %1328 = vmatpush1.bf16.msra.mxu0 %v2466_v8  ;;  %1288 = vmatprep.subr.bf16.mxu1 %v2467_v9  ;;  %v2475_v14 = vld [vmem:[#allocation5 + $0x264] ss:$16 sps:$4 sm:$0xff]   ;;  %v2478_v16 = vld [vmem:[#allocation5 + $0x260] ss:$16 sps:$4 sm:$0xff]   ;;  %v2556_v8 = vld [vmem:[#allocation5 + $0xc] ss:$16 sps:$4 sm:$0xff]   ;;  %v3012_v9 = vpack.c.bf16 %v68_v5, %v68_v5 }
  0x41   :  { %1329 = vmatprep.subr.bf16.mxu0 %v2469_v10  ;;  %v2479_v17 = vld [vmem:[#allocation5 + $0x84] ss:$16 sps:$4 sm:$0xff]   ;;  %v2483_v19 = vld [vmem:[#allocation5 + $0x80] ss:$16 sps:$4 sm:$0xff]   ;;  %v2640_v5 = vld [vmem:[#allocation5 + $0x1cc] ss:$16 sps:$4 sm:$0xff]  }
  0x42   :  { %v2481_v18 = vld [vmem:[#allocation5 + $0x284] ss:$16 sps:$4 sm:$0xff]   ;;  %v2484_v20 = vld [vmem:[#allocation5 + $0x280] ss:$16 sps:$4 sm:$0xff]  }
  0x43   :  { %1289 = vmatpush1.bf16.msra.mxu1 %v2471_v11  ;;  %v2485_v21 = vld [vmem:[#allocation5 + $0xa4] ss:$16 sps:$4 sm:$0xff]   ;;  %v2489_v23 = vld [vmem:[#allocation5 + $0xa0] ss:$16 sps:$4 sm:$0xff]   ;;  %v2554_v11 = vld [vmem:[#allocation5 + $0x8] ss:$16 sps:$4 sm:$0xff]  }
  0x44   :  { %1330 = vmatpush1.bf16.msra.mxu0 %v2472_v12  ;;  %1290 = vmatprep.subr.bf16.mxu1 %v2473_v13  ;;  %v2487_v22 = vld [vmem:[#allocation5 + $0x2a4] ss:$16 sps:$4 sm:$0xff]   ;;  %v2490_v24 = vld [vmem:[#allocation5 + $0x2a0] ss:$16 sps:$4 sm:$0xff]   ;;  %v3014_v12 = vpack.c.bf16 %v70_v7, %v70_v7  ;;  %v2638_v7 = vld [vmem:[#allocation5 + $0x1c8] ss:$16 sps:$4 sm:$0xff]  }
  0x45   :  { %1331 = vmatprep.subr.bf16.mxu0 %v2475_v14  ;;  %v2491_v25 = vld [vmem:[#allocation5 + $0xc4] ss:$16 sps:$4 sm:$0xff]   ;;  %v2495_v27 = vld [vmem:[#allocation5 + $0xc0] ss:$16 sps:$4 sm:$0xff]   ;;  %v2562_v14 = vld [vmem:[#allocation5 + $0x2c] ss:$16 sps:$4 sm:$0xff]  }
  0x46   :  { %v2493_v26 = vld [vmem:[#allocation5 + $0x2c4] ss:$16 sps:$4 sm:$0xff]   ;;  %v2496_v28 = vld [vmem:[#allocation5 + $0x2c0] ss:$16 sps:$4 sm:$0xff]  }
  0x47   :  { %1291 = vmatpush1.bf16.msra.mxu1 %v2477_v15  ;;  %v2497_v29 = vld [vmem:[#allocation5 + $0xe4] ss:$16 sps:$4 sm:$0xff]   ;;  %v2501_v31 = vld [vmem:[#allocation5 + $0xe0] ss:$16 sps:$4 sm:$0xff]  }
  0x48   :  { %1332 = vmatpush1.bf16.msra.mxu0 %v2478_v16  ;;  %1292 = vmatprep.subr.bf16.mxu1 %v2479_v17  ;;  %v2499_v30 = vld [vmem:[#allocation5 + $0x2e4] ss:$16 sps:$4 sm:$0xff]   ;;  %v2502_v32 = vld [vmem:[#allocation5 + $0x2e0] ss:$16 sps:$4 sm:$0xff]   ;;  %v2560_v16 = vld [vmem:[#allocation5 + $0x28] ss:$16 sps:$4 sm:$0xff]  }
  0x49   :  { %1333 = vmatprep.subr.bf16.mxu0 %v2481_v18  ;;  %v2503_v33 = vld [vmem:[#allocation5 + $0x104] ss:$16 sps:$4 sm:$0xff]   ;;  %v2507_v35 = vld [vmem:[#allocation5 + $0x100] ss:$16 sps:$4 sm:$0xff]   ;;  %v2568_v18 = vld [vmem:[#allocation5 + $0x4c] ss:$16 sps:$4 sm:$0xff]  }
  0x4a   :  { %v2505_v34 = vld [vmem:[#allocation5 + $0x304] ss:$16 sps:$4 sm:$0xff]   ;;  %v2508_v36 = vld [vmem:[#allocation5 + $0x300] ss:$16 sps:$4 sm:$0xff]  }
  0x4b   :  { %1293 = vmatpush1.bf16.msra.mxu1 %v2483_v19  ;;  %v2509_v37 = vld [vmem:[#allocation5 + $0x124] ss:$16 sps:$4 sm:$0xff]   ;;  %v2513_v39 = vld [vmem:[#allocation5 + $0x120] ss:$16 sps:$4 sm:$0xff]  }
  0x4c   :  { %1334 = vmatpush1.bf16.msra.mxu0 %v2484_v20  ;;  %1294 = vmatprep.subr.bf16.mxu1 %v2485_v21  ;;  %v2511_v38 = vld [vmem:[#allocation5 + $0x324] ss:$16 sps:$4 sm:$0xff]   ;;  %v2514_v40 = vld [vmem:[#allocation5 + $0x320] ss:$16 sps:$4 sm:$0xff]   ;;  %v2566_v20 = vld [vmem:[#allocation5 + $0x48] ss:$16 sps:$4 sm:$0xff]  }
  0x4d   :  { %1335 = vmatprep.subr.bf16.mxu0 %v2487_v22  ;;  %v2515_v41 = vld [vmem:[#allocation5 + $0x144] ss:$16 sps:$4 sm:$0xff]   ;;  %v2519_v43 = vld [vmem:[#allocation5 + $0x140] ss:$16 sps:$4 sm:$0xff]   ;;  %v2574_v22 = vld [vmem:[#allocation5 + $0x6c] ss:$16 sps:$4 sm:$0xff]  }
  0x4e   :  { %v2517_v42 = vld [vmem:[#allocation5 + $0x344] ss:$16 sps:$4 sm:$0xff]   ;;  %v2520_v44 = vld [vmem:[#allocation5 + $0x340] ss:$16 sps:$4 sm:$0xff]  }
  0x4f   :  { %1295 = vmatpush1.bf16.msra.mxu1 %v2489_v23  ;;  %v2521_v45 = vld [vmem:[#allocation5 + $0x164] ss:$16 sps:$4 sm:$0xff]   ;;  %v2525_v48 = vld [vmem:[#allocation5 + $0x160] ss:$16 sps:$4 sm:$0xff]  }
  0x50   :  { %1336 = vmatpush1.bf16.msra.mxu0 %v2490_v24  ;;  %1296 = vmatprep.subr.bf16.mxu1 %v2491_v25  ;;  %v2523_v46 = vld [vmem:[#allocation5 + $0x364] ss:$16 sps:$4 sm:$0xff]   ;;  %v2526_v51 = vld [vmem:[#allocation5 + $0x360] ss:$16 sps:$4 sm:$0xff]   ;;  %v2572_v24 = vld [vmem:[#allocation5 + $0x68] ss:$16 sps:$4 sm:$0xff]  }
  0x51   :  { %1337 = vmatprep.subr.bf16.mxu0 %v2493_v26  ;;  %v69_v47 = vld [vmem:[#allocation3 + $0x8] sm:$0xff]  ;;  %v71_v50 = vld [vmem:[#allocation3 + $0x18] sm:$0xff]  ;;  %v2580_v26 = vld [vmem:[#allocation5 + $0x8c] ss:$16 sps:$4 sm:$0xff]  }
  0x52   :  { %v3006_v49 = vpack.c.bf16 %v69_v47, %v69_v47  ;;  %v2527_v52 = vld [vmem:[#allocation5 + $0x184] ss:$16 sps:$4 sm:$0xff]   ;;  %v3008_v53 = vpack.c.bf16 %v71_v50, %v71_v50  ;;  %v2531_v55 = vld [vmem:[#allocation5 + $0x180] ss:$16 sps:$4 sm:$0xff]   ;;  %v2608_v50 = vld [vmem:[#allocation5 + $0x128] ss:$16 sps:$4 sm:$0xff]  }
  0x53   :  { %1297 = vmatpush1.bf16.msra.mxu1 %v2495_v27  ;;  %v2529_v54 = vld [vmem:[#allocation5 + $0x384] ss:$16 sps:$4 sm:$0xff]   ;;  %v2532_v56 = vld [vmem:[#allocation5 + $0x380] ss:$16 sps:$4 sm:$0xff]  }
  0x54   :  { %1338 = vmatpush1.bf16.msra.mxu0 %v2496_v28  ;;  %1298 = vmatprep.subr.bf16.mxu1 %v2497_v29  ;;  %v2533_v57 = vld [vmem:[#allocation5 + $0x1a4] ss:$16 sps:$4 sm:$0xff]   ;;  %v2537_v59 = vld [vmem:[#allocation5 + $0x1a0] ss:$16 sps:$4 sm:$0xff]   ;;  %v2578_v28 = vld [vmem:[#allocation5 + $0x88] ss:$16 sps:$4 sm:$0xff]  }
  0x55   :  { %1339 = vmatprep.subr.bf16.mxu0 %v2499_v30  ;;  %1316 = vmatprep.mubr.bf16.mxu1 %v3006_v49  ;;  %v2535_v58 = vld [vmem:[#allocation5 + $0x3a4] ss:$16 sps:$4 sm:$0xff]   ;;  %v2538_v60 = vld [vmem:[#allocation5 + $0x3a0] ss:$16 sps:$4 sm:$0xff]   ;;  %v2586_v30 = vld [vmem:[#allocation5 + $0xac] ss:$16 sps:$4 sm:$0xff]  }
  0x56   :  { %1357 = vmatprep.mubr.bf16.mxu0 %v3008_v53  ;;  %v2539_v61 = vld [vmem:[#allocation5 + $0x1c4] ss:$16 sps:$4 sm:$0xff]   ;;  %v2543_v63 = vld [vmem:[#allocation5 + $0x1c0] ss:$16 sps:$4 sm:$0xff]  }
  0x57   :  { %1299 = vmatpush1.bf16.msra.mxu1 %v2501_v31  ;;  %v2541_v62 = vld [vmem:[#allocation5 + $0x3c4] ss:$16 sps:$4 sm:$0xff]   ;;  %v2544_v0 = vld [vmem:[#allocation5 + $0x3c0] ss:$16 sps:$4 sm:$0xff]  }
  0x58   :  { %1340 = vmatpush1.bf16.msra.mxu0 %v2502_v32  ;;  %1300 = vmatprep.subr.bf16.mxu1 %v2503_v33  ;;  %v2545_v1 = vld [vmem:[#allocation5 + $0x1e4] ss:$16 sps:$4 sm:$0xff]   ;;  %v2549_v3 = vld [vmem:[#allocation5 + $0x1e0] ss:$16 sps:$4 sm:$0xff]   ;;  %v2584_v32 = vld [vmem:[#allocation5 + $0xa8] ss:$16 sps:$4 sm:$0xff]  }
  0x59   :  { %1341 = vmatprep.subr.bf16.mxu0 %v2505_v34  ;;  %v2547_v2 = vld [vmem:[#allocation5 + $0x3e4] ss:$16 sps:$4 sm:$0xff]   ;;  %v2550_v4 = vld [vmem:[#allocation5 + $0x3e0] ss:$16 sps:$4 sm:$0xff]   ;;  %v2592_v34 = vld [vmem:[#allocation5 + $0xcc] ss:$16 sps:$4 sm:$0xff]  }
  0x5a   :  { %v2553_v6 = vld [vmem:[#allocation5 + $0x404] ss:$16 sps:$4 sm:$0xff]   ;;  %v2551_v10 = vld [vmem:[#allocation5 + $0x400] ss:$16 sps:$4 sm:$0xff]  }
  0x5b   :  { %1301 = vmatpush1.bf16.msra.mxu1 %v2507_v35  ;;  %v2559_v13 = vld [vmem:[#allocation5 + $0x424] ss:$16 sps:$4 sm:$0xff]   ;;  %v2557_v15 = vld [vmem:[#allocation5 + $0x420] ss:$16 sps:$4 sm:$0xff]  }
  0x5c   :  { %1342 = vmatpush1.bf16.msra.mxu0 %v2508_v36  ;;  %1302 = vmatprep.subr.bf16.mxu1 %v2509_v37  ;;  %v2565_v17 = vld [vmem:[#allocation5 + $0x444] ss:$16 sps:$4 sm:$0xff]   ;;  %v2563_v19 = vld [vmem:[#allocation5 + $0x440] ss:$16 sps:$4 sm:$0xff]  }
  0x5d   :  { %1343 = vmatprep.subr.bf16.mxu0 %v2511_v38  ;;  %v2571_v21 = vld [vmem:[#allocation5 + $0x464] ss:$16 sps:$4 sm:$0xff]   ;;  %v2569_v23 = vld [vmem:[#allocation5 + $0x460] ss:$16 sps:$4 sm:$0xff]   ;;  %v2590_v38 = vld [vmem:[#allocation5 + $0xc8] ss:$16 sps:$4 sm:$0xff]  }
  0x5e   :  { %v2577_v25 = vld [vmem:[#allocation5 + $0x484] ss:$16 sps:$4 sm:$0xff]   ;;  %v2575_v27 = vld [vmem:[#allocation5 + $0x480] ss:$16 sps:$4 sm:$0xff]  }
  0x5f   :  { %1303 = vmatpush1.bf16.msra.mxu1 %v2513_v39  ;;  %v2583_v29 = vld [vmem:[#allocation5 + $0x4a4] ss:$16 sps:$4 sm:$0xff]   ;;  %v2581_v31 = vld [vmem:[#allocation5 + $0x4a0] ss:$16 sps:$4 sm:$0xff]  }
  0x60   :  { %1344 = vmatpush1.bf16.msra.mxu0 %v2514_v40  ;;  %1304 = vmatprep.subr.bf16.mxu1 %v2515_v41  ;;  %v2589_v33 = vld [vmem:[#allocation5 + $0x4c4] ss:$16 sps:$4 sm:$0xff]   ;;  %v2587_v37 = vld [vmem:[#allocation5 + $0x4c0] ss:$16 sps:$4 sm:$0xff]   ;;  %v2598_v40 = vld [vmem:[#allocation5 + $0xec] ss:$16 sps:$4 sm:$0xff]  }
  0x61   :  { %1345 = vmatprep.subr.bf16.mxu0 %v2517_v42  ;;  %v73_v35 = vld [vmem:[#allocation3 + $0x28] sm:$0xff]  ;;  %v2596_v42 = vld [vmem:[#allocation5 + $0xe8] ss:$16 sps:$4 sm:$0xff]  }
  0x62   :  { %v3019_v36 = vpack.c.bf16 %v73_v35, %v73_v35  ;;  %v2595_v39 = vld [vmem:[#allocation5 + $0x4e4] ss:$16 sps:$4 sm:$0xff]   ;;  %v2593_v41 = vld [vmem:[#allocation5 + $0x4e0] ss:$16 sps:$4 sm:$0xff]  }
  0x63   :  { %1305 = vmatpush1.bf16.msra.mxu1 %v2519_v43  ;;  %v2601_v43 = vld [vmem:[#allocation5 + $0x504] ss:$16 sps:$4 sm:$0xff]  }
  0x64   :  { %1346 = vmatpush1.bf16.msra.mxu0 %v2520_v44  ;;  %1306 = vmatprep.subr.bf16.mxu1 %v2521_v45  ;;  %v2604_v44 = vld [vmem:[#allocation5 + $0x10c] ss:$16 sps:$4 sm:$0xff]   ;;  %v2599_v45 = vld [vmem:[#allocation5 + $0x500] ss:$16 sps:$4 sm:$0xff]   ;;  %v2607_v47 = vld [vmem:[#allocation5 + $0x524] ss:$16 sps:$4 sm:$0xff]  }
  0x65   :  { %1347 = vmatprep.subr.bf16.mxu0 %v2523_v46  ;;  %v2602_v46 = vld [vmem:[#allocation5 + $0x108] ss:$16 sps:$4 sm:$0xff]   ;;  %v2751_v35 = vld [vmem:[#allocation7 + $0x4] ss:$8 sps:$4 sm:$0xff]  }
  0x67   :  { %1307 = vmatpush1.bf16.msra.mxu1 %v2525_v48  ;;  %v2610_v48 = vld [vmem:[#allocation5 + $0x12c] ss:$16 sps:$4 sm:$0xff]  }
  0x68   :  { %1348 = vmatpush1.bf16.msra.mxu0 %v2526_v51  ;;  %1308 = vmatprep.subr.bf16.mxu1 %v2527_v52  ;;  %v2613_v51 = vld [vmem:[#allocation5 + $0x544] ss:$16 sps:$4 sm:$0xff]   ;;  %v2616_v52 = vld [vmem:[#allocation5 + $0x14c] ss:$16 sps:$4 sm:$0xff]  }
  0x69   :  { %1349 = vmatprep.subr.bf16.mxu0 %v2529_v54  ;;  %v2611_v54 = vld [vmem:[#allocation5 + $0x540] ss:$16 sps:$4 sm:$0xff]  }
  0x6b   :  { %1309 = vmatpush1.bf16.msra.mxu1 %v2531_v55  ;;  %v2614_v55 = vld [vmem:[#allocation5 + $0x148] ss:$16 sps:$4 sm:$0xff]  }
  0x6c   :  { %1350 = vmatpush1.bf16.msra.mxu0 %v2532_v56  ;;  %1310 = vmatprep.subr.bf16.mxu1 %v2533_v57  ;;  %v2619_v56 = vld [vmem:[#allocation5 + $0x564] ss:$16 sps:$4 sm:$0xff]   ;;  %v2622_v57 = vld [vmem:[#allocation5 + $0x16c] ss:$16 sps:$4 sm:$0xff]  }
  0x6d   :  { %1351 = vmatprep.subr.bf16.mxu0 %v2535_v58  ;;  %v2617_v58 = vld [vmem:[#allocation5 + $0x560] ss:$16 sps:$4 sm:$0xff]  }
  0x6f   :  { %1311 = vmatpush1.bf16.msra.mxu1 %v2537_v59  ;;  %v2620_v59 = vld [vmem:[#allocation5 + $0x168] ss:$16 sps:$4 sm:$0xff]  }
  0x70   :  { %1352 = vmatpush1.bf16.msra.mxu0 %v2538_v60  ;;  %1312 = vmatprep.subr.bf16.mxu1 %v2539_v61  ;;  %v2625_v60 = vld [vmem:[#allocation5 + $0x584] ss:$16 sps:$4 sm:$0xff]   ;;  %v2628_v61 = vld [vmem:[#allocation5 + $0x18c] ss:$16 sps:$4 sm:$0xff]  }
  0x71   :  { %1353 = vmatprep.subr.bf16.mxu0 %v2541_v62  ;;  %v2623_v62 = vld [vmem:[#allocation5 + $0x580] ss:$16 sps:$4 sm:$0xff]  }
  0x73   :  { %1313 = vmatpush1.bf16.msra.mxu1 %v2543_v63  ;;  %v2626_v63 = vld [vmem:[#allocation5 + $0x188] ss:$16 sps:$4 sm:$0xff]  }
  0x74   :  { %1354 = vmatpush1.bf16.msra.mxu0 %v2544_v0  ;;  %1314 = vmatprep.subr.bf16.mxu1 %v2545_v1  ;;  %v2631_v0 = vld [vmem:[#allocation5 + $0x5a4] ss:$16 sps:$4 sm:$0xff]   ;;  %v2634_v1 = vld [vmem:[#allocation5 + $0x1ac] ss:$16 sps:$4 sm:$0xff]  }
  0x75   :  { %1355 = vmatprep.subr.bf16.mxu0 %v2547_v2  ;;  %v2629_v2 = vld [vmem:[#allocation5 + $0x5a0] ss:$16 sps:$4 sm:$0xff]  }
  0x77   :  { %1315 = vmatpush1.bf16.msra.mxu1 %v2549_v3  ;;  %v2632_v3 = vld [vmem:[#allocation5 + $0x1a8] ss:$16 sps:$4 sm:$0xff]  }
  0x78   :  { %1356 = vmatpush1.bf16.msra.mxu0 %v2550_v4  ;;  %1448 = vmatprep.subr.bf16.mxu1 %v2556_v8  ;;  %v2637_v4 = vld [vmem:[#allocation5 + $0x5c4] ss:$16 sps:$4 sm:$0xff]  }
  0x79   :  { %1366 = vmatprep.subr.bf16.mxu0 %v2553_v6  ;;  %v2635_v6 = vld [vmem:[#allocation5 + $0x5c0] ss:$16 sps:$4 sm:$0xff]   ;;  %v2643_v8 = vld [vmem:[#allocation5 + $0x5e4] ss:$16 sps:$4 sm:$0xff]  }
  0x7a   :  { %1317 = vmatmul.mubr.bf16.vlgmr.msra.gmra.mrb[0].mxu1 %v3012_v9 }
  0x7b   :  { %1358 = vmatmul.mubr.bf16.vlgmr.msra.gmra.mrb[0].mxu0 %v3014_v12  ;;  %1449 = vmatpush1.bf16.msra.mxu1 %v2554_v11  ;;  %v2641_v11 = vld [vmem:[#allocation5 + $0x5e0] ss:$16 sps:$4 sm:$0xff]  }
  0x7c   :  { %1367 = vmatpush1.bf16.msra.mxu0 %v2551_v10  ;;  %1450 = vmatprep.subr.bf16.mxu1 %v2562_v14  ;;  %v2646_v10 = vld [vmem:[#allocation5 + $0x1ec] ss:$16 sps:$4 sm:$0xff]  }
  0x7d   :  { %1368 = vmatprep.subr.bf16.mxu0 %v2559_v13  ;;  %1480 = vmatprep.mubr.bf16.mxu1 %v3006_v49  ;;  %v2605_v49 = vld [vmem:[#allocation5 + $0x520] ss:$16 sps:$4 sm:$0xff]   ;;  %v2644_v13 = vld [vmem:[#allocation5 + $0x1e8] ss:$16 sps:$4 sm:$0xff]  }
  0x7e   :  { %1398 = vmatprep.mubr.bf16.mxu0 %v3019_v36  ;;  %v72_v14 = vld [vmem:[#allocation3 + $0x20] sm:$0xff] }
  0x7f   :  { %1451 = vmatpush1.bf16.msra.mxu1 %v2560_v16  ;;  %v2655_v16 = vld [vmem:[#allocation5 + $0x604] ss:$16 sps:$4 sm:$0xff]  }
  0x80   :  { %1369 = vmatpush1.bf16.msra.mxu0 %v2557_v15  ;;  %1452 = vmatprep.subr.bf16.mxu1 %v2568_v18  ;;  %v2649_v15 = vld [vmem:[#allocation5 + $0x20c] ss:$16 sps:$4 sm:$0xff]   ;;  %v2647_v18 = vld [vmem:[#allocation5 + $0x208] ss:$16 sps:$4 sm:$0xff]  }
  0x81   :  { %1370 = vmatprep.subr.bf16.mxu0 %v2565_v17  ;;  %v3022_v17 = vpack.c.bf16 %v72_v14, %v72_v14  ;;  %v2703_v14 = vld [vmem:[#allocation5 + $0x42c] ss:$16 sps:$4 sm:$0xff]  }
  0x83   :  { %1453 = vmatpush1.bf16.msra.mxu1 %v2566_v20  ;;  %v2652_v20 = vld [vmem:[#allocation5 + $0x22c] ss:$16 sps:$4 sm:$0xff]  }
  0x84   :  { %1371 = vmatpush1.bf16.msra.mxu0 %v2563_v19  ;;  %1454 = vmatprep.subr.bf16.mxu1 %v2574_v22  ;;  %v2653_v19 = vld [vmem:[#allocation5 + $0x600] ss:$16 sps:$4 sm:$0xff]   ;;  %v2658_v22 = vld [vmem:[#allocation5 + $0x24c] ss:$16 sps:$4 sm:$0xff]  }
  0x85   :  { %1372 = vmatprep.subr.bf16.mxu0 %v2571_v21  ;;  %v2650_v21 = vld [vmem:[#allocation5 + $0x228] ss:$16 sps:$4 sm:$0xff]  }
  0x87   :  { %1455 = vmatpush1.bf16.msra.mxu1 %v2572_v24  ;;  %v2656_v24 = vld [vmem:[#allocation5 + $0x248] ss:$16 sps:$4 sm:$0xff]  }
  0x88   :  { %1373 = vmatpush1.bf16.msra.mxu0 %v2569_v23  ;;  %1456 = vmatprep.subr.bf16.mxu1 %v2580_v26  ;;  %v2926_v23 = vmov 0   ;;  %v2661_v26 = vld [vmem:[#allocation5 + $0x26c] ss:$16 sps:$4 sm:$0xff]  }
  0x89   :  { %1374 = vmatprep.subr.bf16.mxu0 %v2577_v25  ;;  %v74_v25 = vld [vmem:[#allocation3 + $0x30] sm:$0xff] }
  0x8b   :  { %1457 = vmatpush1.bf16.msra.mxu1 %v2578_v28  ;;  %v3028_v28 = vpack.c.bf16 %v74_v25, %v74_v25  ;;  %v2785_v25 = vld [vmem:[#allocation7 + $0xc0] ss:$8 sps:$4 sm:$0xff]  }
  0x8c   :  { %1375 = vmatpush1.bf16.msra.mxu0 %v2575_v27  ;;  %1458 = vmatprep.subr.bf16.mxu1 %v2586_v30  ;;  %v2659_v27 = vld [vmem:[#allocation5 + $0x268] ss:$16 sps:$4 sm:$0xff]   ;;  %v2667_v30 = vld [vmem:[#allocation5 + $0x2ac] ss:$16 sps:$4 sm:$0xff]  }
  0x8d   :  { %1376 = vmatprep.subr.bf16.mxu0 %v2583_v29  ;;  %v2664_v29 = vld [vmem:[#allocation5 + $0x28c] ss:$16 sps:$4 sm:$0xff]  }
  0x8f   :  { %1459 = vmatpush1.bf16.msra.mxu1 %v2584_v32  ;;  %v2670_v32 = vld [vmem:[#allocation5 + $0x2cc] ss:$16 sps:$4 sm:$0xff]  }
  0x90   :  { %1377 = vmatpush1.bf16.msra.mxu0 %v2581_v31  ;;  %1460 = vmatprep.subr.bf16.mxu1 %v2592_v34  ;;  %v2665_v31 = vld [vmem:[#allocation5 + $0x2a8] ss:$16 sps:$4 sm:$0xff]  }
  0x91   :  { %1378 = vmatprep.subr.bf16.mxu0 %v2589_v33  ;;  %v2673_v33 = vld [vmem:[#allocation5 + $0x2ec] ss:$16 sps:$4 sm:$0xff]   ;;  %v2749_v34 = vld [vmem:[#allocation7] ss:$8 sps:$4 sm:$0xff]  }
  0x93   :  { %1461 = vmatpush1.bf16.msra.mxu1 %v2590_v38  ;;  %v2671_v38 = vld [vmem:[#allocation5 + $0x2e8] ss:$16 sps:$4 sm:$0xff]  }
  0x94   :  { %1379 = vmatpush1.bf16.msra.mxu0 %v2587_v37  ;;  %1462 = vmatprep.subr.bf16.mxu1 %v2598_v40  ;;  %v2754_v37 = vld [vmem:[#allocation7 + $0x14] ss:$8 sps:$4 sm:$0xff]  }
  0x95   :  { %1380 = vmatprep.subr.bf16.mxu0 %v2595_v39  ;;  %v2752_v39 = vld [vmem:[#allocation7 + $0x10] ss:$8 sps:$4 sm:$0xff]   ;;  %v2676_v40 = vld [vmem:[#allocation5 + $0x30c] ss:$16 sps:$4 sm:$0xff]  }
  0x97   :  { %1463 = vmatpush1.bf16.msra.mxu1 %v2596_v42  ;;  %v2674_v42 = vld [vmem:[#allocation5 + $0x308] ss:$16 sps:$4 sm:$0xff]  }
  0x98   :  { %1381 = vmatpush1.bf16.msra.mxu0 %v2593_v41  ;;  %1464 = vmatprep.subr.bf16.mxu1 %v2604_v44  ;;  %v2757_v41 = vld [vmem:[#allocation7 + $0x24] ss:$8 sps:$4 sm:$0xff]  }
  0x99   :  { %1382 = vmatprep.subr.bf16.mxu0 %v2601_v43  ;;  %v2755_v43 = vld [vmem:[#allocation7 + $0x20] ss:$8 sps:$4 sm:$0xff]   ;;  %v2679_v44 = vld [vmem:[#allocation5 + $0x32c] ss:$16 sps:$4 sm:$0xff]  }
  0x9b   :  { %1465 = vmatpush1.bf16.msra.mxu1 %v2602_v46  ;;  %v2677_v46 = vld [vmem:[#allocation5 + $0x328] ss:$16 sps:$4 sm:$0xff]  }
  0x9c   :  { %1383 = vmatpush1.bf16.msra.mxu0 %v2599_v45  ;;  %1466 = vmatprep.subr.bf16.mxu1 %v2610_v48  ;;  %v2760_v45 = vld [vmem:[#allocation7 + $0x34] ss:$8 sps:$4 sm:$0xff]  }
  0x9d   :  { %1384 = vmatprep.subr.bf16.mxu0 %v2607_v47  ;;  %v2758_v47 = vld [vmem:[#allocation7 + $0x30] ss:$8 sps:$4 sm:$0xff]   ;;  %v2682_v48 = vld [vmem:[#allocation5 + $0x34c] ss:$16 sps:$4 sm:$0xff]  }
  0x9f   :  { %1467 = vmatpush1.bf16.msra.mxu1 %v2608_v50  ;;  %v2680_v50 = vld [vmem:[#allocation5 + $0x348] ss:$16 sps:$4 sm:$0xff]  }
  0xa0   :  { %1385 = vmatpush1.bf16.msra.mxu0 %v2605_v49  ;;  %1468 = vmatprep.subr.bf16.mxu1 %v2616_v52  ;;  %v2763_v49 = vld [vmem:[#allocation7 + $0x44] ss:$8 sps:$4 sm:$0xff]  }
  0xa1   :  { %1386 = vmatprep.subr.bf16.mxu0 %v2613_v51  ;;  %v2761_v51 = vld [vmem:[#allocation7 + $0x40] ss:$8 sps:$4 sm:$0xff]   ;;  %v2685_v52 = vld [vmem:[#allocation5 + $0x36c] ss:$16 sps:$4 sm:$0xff]  }
  0xa3   :  { %1469 = vmatpush1.bf16.msra.mxu1 %v2614_v55  ;;  %v2683_v55 = vld [vmem:[#allocation5 + $0x368] ss:$16 sps:$4 sm:$0xff]  }
  0xa4   :  { %1387 = vmatpush1.bf16.msra.mxu0 %v2611_v54  ;;  %1470 = vmatprep.subr.bf16.mxu1 %v2622_v57  ;;  %v2766_v54 = vld [vmem:[#allocation7 + $0x54] ss:$8 sps:$4 sm:$0xff]  }
  0xa5   :  { %1388 = vmatprep.subr.bf16.mxu0 %v2619_v56  ;;  %v2764_v56 = vld [vmem:[#allocation7 + $0x50] ss:$8 sps:$4 sm:$0xff]   ;;  %v2688_v57 = vld [vmem:[#allocation5 + $0x38c] ss:$16 sps:$4 sm:$0xff]  }
  0xa7   :  { %1471 = vmatpush1.bf16.msra.mxu1 %v2620_v59  ;;  %v2686_v59 = vld [vmem:[#allocation5 + $0x388] ss:$16 sps:$4 sm:$0xff]  }
  0xa8   :  { %1389 = vmatpush1.bf16.msra.mxu0 %v2617_v58  ;;  %1472 = vmatprep.subr.bf16.mxu1 %v2628_v61  ;;  %v2769_v58 = vld [vmem:[#allocation7 + $0x64] ss:$8 sps:$4 sm:$0xff]  }
  0xa9   :  { %1390 = vmatprep.subr.bf16.mxu0 %v2625_v60  ;;  %v2767_v60 = vld [vmem:[#allocation7 + $0x60] ss:$8 sps:$4 sm:$0xff]   ;;  %v2691_v61 = vld [vmem:[#allocation5 + $0x3ac] ss:$16 sps:$4 sm:$0xff]  }
  0xab   :  { %1473 = vmatpush1.bf16.msra.mxu1 %v2626_v63  ;;  %v2689_v63 = vld [vmem:[#allocation5 + $0x3a8] ss:$16 sps:$4 sm:$0xff]  }
  0xac   :  { %1391 = vmatpush1.bf16.msra.mxu0 %v2623_v62  ;;  %1474 = vmatprep.subr.bf16.mxu1 %v2634_v1  ;;  %v2772_v62 = vld [vmem:[#allocation7 + $0x74] ss:$8 sps:$4 sm:$0xff]  }
  0xad   :  { %1392 = vmatprep.subr.bf16.mxu0 %v2631_v0  ;;  %v2770_v0 = vld [vmem:[#allocation7 + $0x70] ss:$8 sps:$4 sm:$0xff]   ;;  %v2694_v1 = vld [vmem:[#allocation5 + $0x3cc] ss:$16 sps:$4 sm:$0xff]  }
  0xaf   :  { %1475 = vmatpush1.bf16.msra.mxu1 %v2632_v3  ;;  %v2692_v3 = vld [vmem:[#allocation5 + $0x3c8] ss:$16 sps:$4 sm:$0xff]  }
  0xb0   :  { %1393 = vmatpush1.bf16.msra.mxu0 %v2629_v2  ;;  %1476 = vmatprep.subr.bf16.mxu1 %v2640_v5  ;;  %v2775_v2 = vld [vmem:[#allocation7 + $0x84] ss:$8 sps:$4 sm:$0xff]  }
  0xb1   :  { %1394 = vmatprep.subr.bf16.mxu0 %v2637_v4  ;;  %v2773_v4 = vld [vmem:[#allocation7 + $0x80] ss:$8 sps:$4 sm:$0xff]   ;;  %v2697_v5 = vld [vmem:[#allocation5 + $0x3ec] ss:$16 sps:$4 sm:$0xff]  }
  0xb3   :  { %1477 = vmatpush1.bf16.msra.mxu1 %v2638_v7  ;;  %v2695_v7 = vld [vmem:[#allocation5 + $0x3e8] ss:$16 sps:$4 sm:$0xff]  }
  0xb4   :  { %1395 = vmatpush1.bf16.msra.mxu0 %v2635_v6  ;;  %1478 = vmatprep.subr.bf16.mxu1 %v2646_v10  ;;  %v2778_v6 = vld [vmem:[#allocation7 + $0x94] ss:$8 sps:$4 sm:$0xff]  }
  0xb5   :  { %1396 = vmatprep.subr.bf16.mxu0 %v2643_v8  ;;  %v2776_v8 = vld [vmem:[#allocation7 + $0x90] ss:$8 sps:$4 sm:$0xff]   ;;  %v2700_v10 = vld [vmem:[#allocation5 + $0x40c] ss:$16 sps:$4 sm:$0xff]  }
  0xb7   :  { %1479 = vmatpush1.bf16.msra.mxu1 %v2644_v13  ;;  %v2698_v13 = vld [vmem:[#allocation5 + $0x408] ss:$16 sps:$4 sm:$0xff]  }
  0xb8   :  { %1397 = vmatpush1.bf16.msra.mxu0 %v2641_v11  ;;  %1489 = vmatprep.subr.bf16.mxu1 %v2649_v15  ;;  %v2781_v11 = vld [vmem:[#allocation7 + $0xa4] ss:$8 sps:$4 sm:$0xff]   ;;  %v2779_v15 = vld [vmem:[#allocation7 + $0xa0] ss:$8 sps:$4 sm:$0xff]  }
  0xb9   :  { %1407 = vmatprep.subr.bf16.mxu0 %v2655_v16  ;;  %v2784_v16 = vld [vmem:[#allocation7 + $0xb4] ss:$8 sps:$4 sm:$0xff]  }
  0xba   :  { %1481 = vmatmul.mubr.bf16.vlgmr.msra.gmra.mrb[4].mxu1 %v3012_v9  ;;  %v2662_v9 = vld [vmem:[#allocation5 + $0x288] ss:$16 sps:$4 sm:$0xff]  }
  0xbb   :  { %1399 = vmatmul.mubr.bf16.vlgmr.msra.gmra.mrb[0].mxu0 %v3022_v17  ;;  %1490 = vmatpush1.bf16.msra.mxu1 %v2647_v18  ;;  %v2701_v18 = vld [vmem:[#allocation5 + $0x428] ss:$16 sps:$4 sm:$0xff]  }
  0xbc   :  { %1408 = vmatpush1.bf16.msra.mxu0 %v2653_v19  ;;  %1491 = vmatprep.subr.bf16.mxu1 %v2652_v20  ;;  %v2706_v19 = vld [vmem:[#allocation5 + $0x44c] ss:$16 sps:$4 sm:$0xff]   ;;  %v2782_v20 = vld [vmem:[#allocation7 + $0xb0] ss:$8 sps:$4 sm:$0xff]  }
  0xbd   :  { %1439 = vmatprep.mubr.bf16.mxu0 %v2926_v23  ;;  %1521 = vmatprep.mubr.bf16.mxu1 %v3008_v53  ;;  %v2668_v53 = vld [vmem:[#allocation5 + $0x2c8] ss:$16 sps:$4 sm:$0xff]  }
  0xbe   :  { %2024 = vmatprep.subr.bf16.mxu0 %v2751_v35  ;;  %v2722_v35 = vld [vmem:[#allocation5 + $0x508] ss:$16 sps:$4 sm:$0xff]  }
  0xbf   :  { %1492 = vmatpush1.bf16.msra.mxu1 %v2650_v21  ;;  %v2787_v21 = vld [vmem:[#allocation7 + $0xc4] ss:$8 sps:$4 sm:$0xff]  }
  0xc0   :  { %1493 = vmatprep.subr.bf16.mxu1 %v2658_v22  ;;  %v2704_v22 = vld [vmem:[#allocation5 + $0x448] ss:$16 sps:$4 sm:$0xff]  }
  0xc3   :  { %1494 = vmatpush1.bf16.msra.mxu1 %v2656_v24  ;;  %v2709_v24 = vld [vmem:[#allocation5 + $0x46c] ss:$16 sps:$4 sm:$0xff]  }
  0xc4   :  { %1495 = vmatprep.subr.bf16.mxu1 %v2661_v26  ;;  %v2790_v26 = vld [vmem:[#allocation7 + $0xd4] ss:$8 sps:$4 sm:$0xff]  }
  0xc7   :  { %2347 = vmatmul.mubr.msk.bf16.vlgmr.msra.gmra.mrb[0].mxu0 %vm1280_vm0, %v3028_v28  ;;  %1496 = vmatpush1.bf16.msra.mxu1 %v2659_v27  ;;  %v2712_v27 = vld [vmem:[#allocation5 + $0x48c] ss:$16 sps:$4 sm:$0xff]  }
  0xc8   :  { %1497 = vmatprep.subr.bf16.mxu1 %v2664_v29  ;;  %2025 = vmatpush1.bf16.msra.mxu0 %v2749_v34  ;;  %v2710_v29 = vld [vmem:[#allocation5 + $0x488] ss:$16 sps:$4 sm:$0xff]   ;;  %v2724_v34 = vld [vmem:[#allocation5 + $0x50c] ss:$16 sps:$4 sm:$0xff]  }
  0xc9   :  { %2026 = vmatprep.subr.bf16.mxu0 %v2754_v37  ;;  %v2727_v37 = vld [vmem:[#allocation5 + $0x52c] ss:$16 sps:$4 sm:$0xff]  }
  0xcb   :  { %1498 = vmatpush1.bf16.msra.mxu1 %v2662_v9  ;;  %v2715_v9 = vld [vmem:[#allocation5 + $0x4ac] ss:$16 sps:$4 sm:$0xff]  }
  0xcc   :  { %1499 = vmatprep.subr.bf16.mxu1 %v2667_v30  ;;  %2027 = vmatpush1.bf16.msra.mxu0 %v2752_v39  ;;  %v2713_v30 = vld [vmem:[#allocation5 + $0x4a8] ss:$16 sps:$4 sm:$0xff]  }
  0xcd   :  { %2028 = vmatprep.subr.bf16.mxu0 %v2757_v41  ;;  %v2791_v39 = vld [vmem:[#allocation7 + $0xe0] ss:$8 sps:$4 sm:$0xff]   ;;  %v2730_v41 = vld [vmem:[#allocation5 + $0x54c] ss:$16 sps:$4 sm:$0xff]  }
  0xcf   :  { %1500 = vmatpush1.bf16.msra.mxu1 %v2665_v31  ;;  %v2718_v31 = vld [vmem:[#allocation5 + $0x4cc] ss:$16 sps:$4 sm:$0xff]  }
  0xd0   :  { %1501 = vmatprep.subr.bf16.mxu1 %v2670_v32  ;;  %2029 = vmatpush1.bf16.msra.mxu0 %v2755_v43  ;;  %v2716_v32 = vld [vmem:[#allocation5 + $0x4c8] ss:$16 sps:$4 sm:$0xff]  }
  0xd1   :  { %2030 = vmatprep.subr.bf16.mxu0 %v2760_v45  ;;  %v2794_v43 = vld [vmem:[#allocation7 + $0xf0] ss:$8 sps:$4 sm:$0xff]   ;;  %v2733_v45 = vld [vmem:[#allocation5 + $0x56c] ss:$16 sps:$4 sm:$0xff]  }
  0xd3   :  { %1502 = vmatpush1.bf16.msra.mxu1 %v2668_v53  ;;  %v2721_v53 = vld [vmem:[#allocation5 + $0x4ec] ss:$16 sps:$4 sm:$0xff]  }
  0xd4   :  { %1503 = vmatprep.subr.bf16.mxu1 %v2673_v33  ;;  %2031 = vmatpush1.bf16.msra.mxu0 %v2758_v47  ;;  %v2719_v33 = vld [vmem:[#allocation5 + $0x4e8] ss:$16 sps:$4 sm:$0xff]   ;;  %v2799_v47 = vld [vmem:[#allocation7 + $0x104] ss:$8 sps:$4 sm:$0xff]  }
  0xd5   :  { %2032 = vmatprep.subr.bf16.mxu0 %v2763_v49  ;;  %v2734_v49 = vld [vmem:[#allocation5 + $0x588] ss:$16 sps:$4 sm:$0xff]  }
  0xd7   :  { %1504 = vmatpush1.bf16.msra.mxu1 %v2671_v38  ;;  %v2793_v38 = vld [vmem:[#allocation7 + $0xe4] ss:$8 sps:$4 sm:$0xff]  }
  0xd8   :  { %1505 = vmatprep.subr.bf16.mxu1 %v2676_v40  ;;  %2033 = vmatpush1.bf16.msra.mxu0 %v2761_v51  ;;  %v2725_v40 = vld [vmem:[#allocation5 + $0x528] ss:$16 sps:$4 sm:$0xff]  }
  0xd9   :  { %2034 = vmatprep.subr.bf16.mxu0 %v2766_v54  ;;  %v2737_v51 = vld [vmem:[#allocation5 + $0x5a8] ss:$16 sps:$4 sm:$0xff]  }
  0xda   :  { %v2740_v54 = vld [vmem:[#allocation5 + $0x5c8] ss:$16 sps:$4 sm:$0xff]  }
  0xdb   :  { %1506 = vmatpush1.bf16.msra.mxu1 %v2674_v42  ;;  %v2796_v42 = vld [vmem:[#allocation7 + $0xf4] ss:$8 sps:$4 sm:$0xff]  }
  0xdc   :  { %1507 = vmatprep.subr.bf16.mxu1 %v2679_v44  ;;  %2035 = vmatpush1.bf16.msra.mxu0 %v2764_v56  ;;  %v2728_v44 = vld [vmem:[#allocation5 + $0x548] ss:$16 sps:$4 sm:$0xff]  }
  0xdd   :  { %2036 = vmatprep.subr.bf16.mxu0 %v2769_v58  ;;  %v2743_v56 = vld [vmem:[#allocation5 + $0x5e8] ss:$16 sps:$4 sm:$0xff]  }
  0xde   :  { %v2746_v58 = vld [vmem:[#allocation5 + $0x608] ss:$16 sps:$4 sm:$0xff]  }
  0xdf   :  { %1508 = vmatpush1.bf16.msra.mxu1 %v2677_v46  ;;  %v2731_v46 = vld [vmem:[#allocation5 + $0x568] ss:$16 sps:$4 sm:$0xff]  }
  0xe0   :  { %1509 = vmatprep.subr.bf16.mxu1 %v2682_v48  ;;  %2037 = vmatpush1.bf16.msra.mxu0 %v2767_v60  ;;  %v2736_v48 = vld [vmem:[#allocation5 + $0x58c] ss:$16 sps:$4 sm:$0xff]  }
  0xe1   :  { %2038 = vmatprep.subr.bf16.mxu0 %v2772_v62 }
  0xe3   :  { %1510 = vmatpush1.bf16.msra.mxu1 %v2680_v50  ;;  %v2739_v50 = vld [vmem:[#allocation5 + $0x5ac] ss:$16 sps:$4 sm:$0xff]  }
  0xe4   :  { %1511 = vmatprep.subr.bf16.mxu1 %v2685_v52  ;;  %2039 = vmatpush1.bf16.msra.mxu0 %v2770_v0  ;;  %v2742_v52 = vld [vmem:[#allocation5 + $0x5cc] ss:$16 sps:$4 sm:$0xff]  }
  0xe5   :  { %2040 = vmatprep.subr.bf16.mxu0 %v2775_v2 }
  0xe7   :  { %1512 = vmatpush1.bf16.msra.mxu1 %v2683_v55  ;;  %v2745_v55 = vld [vmem:[#allocation5 + $0x5ec] ss:$16 sps:$4 sm:$0xff]  }
  0xe8   :  { %1513 = vmatprep.subr.bf16.mxu1 %v2688_v57  ;;  %2041 = vmatpush1.bf16.msra.mxu0 %v2773_v4  ;;  %v2748_v57 = vld [vmem:[#allocation5 + $0x60c] ss:$16 sps:$4 sm:$0xff]  }
  0xe9   :  { %2042 = vmatprep.subr.bf16.mxu0 %v2778_v6 }
  0xeb   :  { %1514 = vmatpush1.bf16.msra.mxu1 %v2686_v59 }
  0xec   :  { %1515 = vmatprep.subr.bf16.mxu1 %v2691_v61  ;;  %2043 = vmatpush1.bf16.msra.mxu0 %v2776_v8 }
  0xed   :  { %2044 = vmatprep.subr.bf16.mxu0 %v2781_v11 }
  0xef   :  { %1516 = vmatpush1.bf16.msra.mxu1 %v2689_v63  ;;  %v280_v63 = vlaneseq }
  0xf0   :  { %1517 = vmatprep.subr.bf16.mxu1 %v2694_v1  ;;  %2045 = vmatpush1.bf16.msra.mxu0 %v2779_v15 }
  0xf1   :  { %2046 = vmatprep.subr.bf16.mxu0 %v2784_v16  ;;  %v3038_v0 = vshrl.u32 %v280_v63, 7 }
  0xf3   :  { %1518 = vmatpush1.bf16.msra.mxu1 %v2692_v3  ;;  %v3041_v1 = vsub.s32 0, %v3038_v0 }
  0xf4   :  { %1519 = vmatprep.subr.bf16.mxu1 %v2697_v5  ;;  %2047 = vmatpush1.bf16.msra.mxu0 %v2782_v20 }
  0xf5   :  { %2048 = vmatprep.subr.bf16.mxu0 %v2787_v21  ;;  %v2802_v21 = vld [vmem:[#allocation7 + $0x114] ss:$8 sps:$4 sm:$0xff]  }
  0xf7   :  { %1520 = vmatpush1.bf16.msra.mxu1 %v2695_v7 }
  0xf8   :  { %1530 = vmatprep.subr.bf16.mxu1 %v2700_v10  ;;  %2049 = vmatpush1.bf16.msra.mxu0 %v2785_v25  ;;  %v2803_v25 = vld [vmem:[#allocation7 + $0x120] ss:$8 sps:$4 sm:$0xff]  }
  0xf9   :  { %2050 = vmatprep.subr.bf16.mxu0 %v2790_v26  ;;  %v2808_v26 = vld [vmem:[#allocation7 + $0x134] ss:$8 sps:$4 sm:$0xff]  }
  0xfa   :  { %1522 = vmatmul.mubr.bf16.vlgmr.msra.gmra.mrb[4].mxu1 %v3014_v12  ;;  %v2707_v12 = vld [vmem:[#allocation5 + $0x468] ss:$16 sps:$4 sm:$0xff]  }
  0xfb   :  { %1531 = vmatpush1.bf16.msra.mxu1 %v2698_v13  ;;  %1562 = vmatprep.mubr.bf16.mxu1 %v3019_v36  ;;  %v2788_v36 = vld [vmem:[#allocation7 + $0xd0] ss:$8 sps:$4 sm:$0xff]  }
  0xfc   :  { %1532 = vmatprep.subr.bf16.mxu1 %v2703_v14  ;;  %2051 = vmatpush1.bf16.msra.mxu0 %v2788_v36  ;;  %v2809_v36 = vld [vmem:[#allocation7 + $0x140] ss:$8 sps:$4 sm:$0xff]  }
  0xfd   :  { %2052 = vmatprep.subr.bf16.mxu0 %v2793_v38  ;;  %v2829_v38 = vld [vmem:[#allocation7 + $0x1a4] ss:$8 sps:$4 sm:$0xff]  }
  0xff   :  { %1533 = vmatpush1.bf16.msra.mxu1 %v2701_v18 }
 0x100   :  { %1534 = vmatprep.subr.bf16.mxu1 %v2706_v19  ;;  %2053 = vmatpush1.bf16.msra.mxu0 %v2791_v39  ;;  %v2797_v19 = vld [vmem:[#allocation7 + $0x100] ss:$8 sps:$4 sm:$0xff]  }
 0x101   :  { %2054 = vmatprep.subr.bf16.mxu0 %v2796_v42  ;;  %v2827_v39 = vld [vmem:[#allocation7 + $0x1a0] ss:$8 sps:$4 sm:$0xff]   ;;  %v2835_v42 = vld [vmem:[#allocation7 + $0x1c4] ss:$8 sps:$4 sm:$0xff]  }
 0x103   :  { %1535 = vmatpush1.bf16.msra.mxu1 %v2704_v22  ;;  %v2800_v22 = vld [vmem:[#allocation7 + $0x110] ss:$8 sps:$4 sm:$0xff]  }
 0x104   :  { %1536 = vmatprep.subr.bf16.mxu1 %v2709_v24  ;;  %2055 = vmatpush1.bf16.msra.mxu0 %v2794_v43  ;;  %v2805_v24 = vld [vmem:[#allocation7 + $0x124] ss:$8 sps:$4 sm:$0xff]   ;;  %v2833_v43 = vld [vmem:[#allocation7 + $0x1c0] ss:$8 sps:$4 sm:$0xff]  }
 0x105   :  { %2065 = vmatprep.subr.bf16.mxu0 %v2799_v47  ;;  %v2839_v47 = vld [vmem:[#allocation7 + $0x1e0] ss:$8 sps:$4 sm:$0xff]  }
 0x107   :  { %1537 = vmatpush1.bf16.msra.mxu1 %v2707_v12  ;;  %v2806_v12 = vld [vmem:[#allocation7 + $0x130] ss:$8 sps:$4 sm:$0xff]  }
 0x108   :  { %1538 = vmatprep.subr.bf16.mxu1 %v2712_v27  ;;  %v2811_v27 = vld [vmem:[#allocation7 + $0x144] ss:$8 sps:$4 sm:$0xff]  }
 0x10b   :  { %1539 = vmatpush1.bf16.msra.mxu1 %v2710_v29  ;;  %v2814_v29 = vld [vmem:[#allocation7 + $0x154] ss:$8 sps:$4 sm:$0xff]  }
 0x10c   :  { %1540 = vmatprep.subr.bf16.mxu1 %v2715_v9  ;;  %v2812_v9 = vld [vmem:[#allocation7 + $0x150] ss:$8 sps:$4 sm:$0xff]  }
 0x10f   :  { %1541 = vmatpush1.bf16.msra.mxu1 %v2713_v30  ;;  %v2817_v30 = vld [vmem:[#allocation7 + $0x164] ss:$8 sps:$4 sm:$0xff]  }
 0x110   :  { %1542 = vmatprep.subr.bf16.mxu1 %v2718_v31  ;;  %v2815_v31 = vld [vmem:[#allocation7 + $0x160] ss:$8 sps:$4 sm:$0xff]  }
 0x113   :  { %1543 = vmatpush1.bf16.msra.mxu1 %v2716_v32  ;;  %v2820_v32 = vld [vmem:[#allocation7 + $0x174] ss:$8 sps:$4 sm:$0xff]  }
 0x114   :  { %1544 = vmatprep.subr.bf16.mxu1 %v2721_v53  ;;  %v2818_v53 = vld [vmem:[#allocation7 + $0x170] ss:$8 sps:$4 sm:$0xff]  }
 0x117   :  { %1545 = vmatpush1.bf16.msra.mxu1 %v2719_v33  ;;  %v2823_v33 = vld [vmem:[#allocation7 + $0x184] ss:$8 sps:$4 sm:$0xff]  }
 0x118   :  { %1546 = vmatprep.subr.bf16.mxu1 %v2724_v34  ;;  %v2821_v34 = vld [vmem:[#allocation7 + $0x180] ss:$8 sps:$4 sm:$0xff]  }
 0x11b   :  { %1547 = vmatpush1.bf16.msra.mxu1 %v2722_v35  ;;  %v2826_v35 = vld [vmem:[#allocation7 + $0x194] ss:$8 sps:$4 sm:$0xff]  }
 0x11c   :  { %1548 = vmatprep.subr.bf16.mxu1 %v2727_v37  ;;  %v2824_v37 = vld [vmem:[#allocation7 + $0x190] ss:$8 sps:$4 sm:$0xff]  }
 0x11f   :  { %1549 = vmatpush1.bf16.msra.mxu1 %v2725_v40  ;;  %v2832_v40 = vld [vmem:[#allocation7 + $0x1b4] ss:$8 sps:$4 sm:$0xff]  }
 0x120   :  { %1550 = vmatprep.subr.bf16.mxu1 %v2730_v41  ;;  %v2830_v41 = vld [vmem:[#allocation7 + $0x1b0] ss:$8 sps:$4 sm:$0xff]  }
 0x123   :  { %1551 = vmatpush1.bf16.msra.mxu1 %v2728_v44  ;;  %v2838_v44 = vld [vmem:[#allocation7 + $0x1d4] ss:$8 sps:$4 sm:$0xff]  }
 0x124   :  { %1552 = vmatprep.subr.bf16.mxu1 %v2733_v45  ;;  %v2836_v45 = vld [vmem:[#allocation7 + $0x1d0] ss:$8 sps:$4 sm:$0xff]  }
 0x127   :  { %1553 = vmatpush1.bf16.msra.mxu1 %v2731_v46  ;;  %v2841_v46 = vld [vmem:[#allocation7 + $0x1e4] ss:$8 sps:$4 sm:$0xff]  }
 0x128   :  { %1554 = vmatprep.subr.bf16.mxu1 %v2736_v48  ;;  %v2844_v48 = vld [vmem:[#allocation7 + $0x1f4] ss:$8 sps:$4 sm:$0xff]  }
 0x12b   :  { %1555 = vmatpush1.bf16.msra.mxu1 %v2734_v49  ;;  %v2842_v49 = vld [vmem:[#allocation7 + $0x1f0] ss:$8 sps:$4 sm:$0xff]  }
 0x12c   :  { %1556 = vmatprep.subr.bf16.mxu1 %v2739_v50  ;;  %v290_v50 = vsub.s32 2, %v3038_v0 }
 0x12f   :  { %1557 = vmatpush1.bf16.msra.mxu1 %v2737_v51  ;;  %v294_v51 = vsub.s32 3, %v3038_v0 }
 0x130   :  { %1558 = vmatprep.subr.bf16.mxu1 %v2742_v52 }
 0x133   :  { %1559 = vmatpush1.bf16.msra.mxu1 %v2740_v54 }
 0x134   :  { %1560 = vmatprep.subr.bf16.mxu1 %v2745_v55 }
 0x137   :  { %1561 = vmatpush1.bf16.msra.mxu1 %v2743_v56 }
 0x138   :  { %1571 = vmatprep.subr.bf16.mxu1 %v2748_v57 }
 0x13a   :  { %1563 = vmatmul.mubr.bf16.vlgmr.msra.gmra.mrb[4].mxu1 %v3022_v17  ;;  %v3046_v17 = vld [vmem:[%s3074_s2] sm:$0xf] }
 0x13b   :  { %1572 = vmatpush1.bf16.msra.mxu1 %v2746_v58  ;;  %1603 = vmatprep.mubr.bf16.mxu1 %v2926_v23  ;;  %v3049_v23 = vsub.s32 1, %v3038_v0  ;;  %v291_v52 = vrot.slane %v3046_v17, %v290_v50  ;;  %v295_v54 = vrot.slane %v3046_v17, %v294_v51  ;;  %v1692_v0 = vld [vmem:[%s3076_s4] sm:$0x3] }
 0x13d   :  { %v287_v2 = vrot.slane %v3046_v17, %v3049_v23 }
 0x146   :  { %2348 = vmatmul.mubr.msk.bf16.vlgmr.msra.gmra.mrb[4].mxu1 %vm1280_vm0, %v3028_v28  ;;  %v283_v28 = vrot.slane %v3046_v17, %v3041_v1  ;;  %v1697_v17 = vrot.slane %v1692_v0, %v3041_v1 }
 0x14d   :  { %v1318_v59 = vpop.f32.mrb[0].mxu1 }
 0x14e   :  { %v1320_v60 = vpop.f32.mrb[1].mxu1  ;;  %v1319_v3 = vadd.f32 %v1318_v59, %v283_v28 }
 0x14f   :  { %v1322_v61 = vpop.f32.mrb[2].mxu1  ;;  %v1321_v4 = vadd.f32 %v1320_v60, %v287_v2 }
 0x150   :  { %v1323_v62 = vpop.f32.mrb[3].mxu1 }
 0x19a   :  { %v1441_v5 = vpop.f32.mrb[0].mxu0 }
 0x19b   :  { %v2416_v6 = vadd.f32 %v1441_v5, %v1319_v3  ;;  %v1443_v7 = vpop.f32.mrb[1].mxu0  ;;  %v2112_v5 = vld [vmem:[%s3077_s5] sm:$0x3] }
 0x19c   :  { %v2418_v8 = vadd.f32 %v1443_v7, %v1321_v4  ;;  %v1445_v10 = vpop.f32.mrb[2].mxu0  ;;  %v1701_v4 = vrot.slane %v1692_v0, %v3049_v23 }
 0x19d   :  { %vm1612_vm1 = vcmp.gt.f32.partialorder %v2416_v6, 0.0  ;;  %v1616_v11 = vmul.f32 0.2, %v2416_v6  ;;  %v1446_v13 = vpop.f32.mrb[3].mxu0 }
 0x19e   :  { %vm1613_vm2 = vcmp.gt.f32.partialorder %v2418_v8, 0.0  ;;  %v1617_v14 = vmul.f32 0.2, %v2418_v8  ;;  %v2117_v13 = vrot.slane %v2112_v5, %v3041_v1 }
 0x19f   :  { %v1620_v15 = vsel %vm1612_vm1, %v2416_v6, %v1616_v11 }
 0x1a0   :  { %v1621_v16 = vsel %vm1613_vm2, %v2418_v8, %v1617_v14  ;;  %v1624_v20 = vpack.c.bf16 %v1620_v15, %v1620_v15 }
 0x1a1   :  { %v1625_v18 = vpack.c.bf16 %v1621_v16, %v1621_v16  ;;  %v2121_v16 = vrot.slane %v2112_v5, %v3049_v23 }
 0x1a3   :  { %2056 = vmatprep.mubr.bf16.mxu0 %v1625_v18 }
 0x1a4   :  { %2057 = vmatmul.mubr.bf16.vlgmr.msra.gmra.mrb[4].mxu0 %v1624_v20 }
 0x1a5   :  { %2066 = vmatpush1.bf16.msra.mxu0 %v2797_v19 }
 0x1a6   :  { %2067 = vmatprep.subr.bf16.mxu0 %v2802_v21 }
 0x1a9   :  { %2068 = vmatpush1.bf16.msra.mxu0 %v2800_v22 }
 0x1aa   :  { %2069 = vmatprep.subr.bf16.mxu0 %v2805_v24 }
 0x1ad   :  { %2070 = vmatpush1.bf16.msra.mxu0 %v2803_v25  ;;  %v2413_v25 = vld [vmem:[#allocation2] ss:$0 sm:$0xff] }
 0x1ae   :  { %2071 = vmatprep.subr.bf16.mxu0 %v2808_v26 }
 0x1b1   :  { %2072 = vmatpush1.bf16.msra.mxu0 %v2806_v12 }
 0x1b2   :  { %2073 = vmatprep.subr.bf16.mxu0 %v2811_v27 }
 0x1b5   :  { %2074 = vmatpush1.bf16.msra.mxu0 %v2809_v36 }
 0x1b6   :  { %2075 = vmatprep.subr.bf16.mxu0 %v2814_v29 }
 0x1b9   :  { %2076 = vmatpush1.bf16.msra.mxu0 %v2812_v9 }
 0x1ba   :  { %2077 = vmatprep.subr.bf16.mxu0 %v2817_v30 }
 0x1bd   :  { %2078 = vmatpush1.bf16.msra.mxu0 %v2815_v31 }
 0x1be   :  { %2079 = vmatprep.subr.bf16.mxu0 %v2820_v32 }
 0x1c1   :  { %2080 = vmatpush1.bf16.msra.mxu0 %v2818_v53 }
 0x1c2   :  { %2081 = vmatprep.subr.bf16.mxu0 %v2823_v33 }
 0x1c5   :  { %2082 = vmatpush1.bf16.msra.mxu0 %v2821_v34 }
 0x1c6   :  { %2083 = vmatprep.subr.bf16.mxu0 %v2826_v35 }
 0x1c9   :  { %2084 = vmatpush1.bf16.msra.mxu0 %v2824_v37 }
 0x1ca   :  { %2085 = vmatprep.subr.bf16.mxu0 %v2829_v38 }
 0x1cd   :  { %2086 = vmatpush1.bf16.msra.mxu0 %v2827_v39 }
 0x1ce   :  { %2087 = vmatprep.subr.bf16.mxu0 %v2832_v40 }
 0x1d1   :  { %2088 = vmatpush1.bf16.msra.mxu0 %v2830_v41 }
 0x1d2   :  { %2089 = vmatprep.subr.bf16.mxu0 %v2835_v42 }
 0x1d5   :  { %2090 = vmatpush1.bf16.msra.mxu0 %v2833_v43 }
 0x1d6   :  { %2091 = vmatprep.subr.bf16.mxu0 %v2838_v44 }
 0x1d9   :  { %2092 = vmatpush1.bf16.msra.mxu0 %v2836_v45 }
 0x1da   :  { %2093 = vmatprep.subr.bf16.mxu0 %v2841_v46 }
 0x1dd   :  { %2094 = vmatpush1.bf16.msra.mxu0 %v2839_v47 }
 0x1de   :  { %2095 = vmatprep.subr.bf16.mxu0 %v2844_v48 }
 0x1e1   :  { %2096 = vmatpush1.bf16.msra.mxu0 %v2842_v49 }
 0x219   :  { %v1605_v55 = vpop.f32.mrb[4].mxu1 }
 0x21a   :  { %v2419_v56 = vadd.f32 %v1605_v55, %v291_v52  ;;  %v1607_v57 = vpop.f32.mrb[5].mxu1 }
 0x21b   :  { %v2420_v58 = vadd.f32 %v1607_v57, %v295_v54  ;;  %v1609_v59 = vpop.f32.mrb[6].mxu1 }
 0x21c   :  { %vm1614_vm3 = vcmp.gt.f32.partialorder %v2419_v56, 0.0  ;;  %v1618_v60 = vmul.f32 0.2, %v2419_v56  ;;  %v1610_v61 = vpop.f32.mrb[7].mxu1 }
 0x21d   :  { %vm1615_vm4 = vcmp.gt.f32.partialorder %v2420_v58, 0.0  ;;  %v1619_v62 = vmul.f32 0.2, %v2420_v58 }
 0x21e   :  { %v1622_v63 = vsel %vm1614_vm3, %v2419_v56, %v1618_v60 }
 0x21f   :  { %v1623_v28 = vsel %vm1615_vm4, %v2420_v58, %v1619_v62  ;;  %v1626_v3 = vpack.c.bf16 %v1622_v63, %v1622_v63 }
 0x220   :  { %v1627_v2 = vpack.c.bf16 %v1623_v28, %v1623_v28 }
 0x222   :  { %2097 = vmatprep.mubr.bf16.mxu0 %v1627_v2 }
 0x223   :  { %2098 = vmatmul.mubr.bf16.vlgmr.msra.gmra.mrb[4].mxu0 %v1626_v3 }
 0x2f6   :  { %v2099_v6 = vpop.f32.mrb[4].mxu0 }
 0x2f7   :  { %v2421_v7 = vadd.f32 %v2099_v6, %v1697_v17  ;;  %v2101_v8 = vpop.f32.mrb[5].mxu0 }
 0x2f8   :  { %v2422_v10 = vadd.f32 %v2101_v8, %v1701_v4  ;;  %v2103_v11 = vpop.f32.mrb[6].mxu0 }
 0x2f9   :  { %vm2106_vm5 = vcmp.gt.f32.partialorder %v2421_v7, 0.0  ;;  %v2108_v14 = vmul.f32 0.2, %v2421_v7  ;;  %v2104_v15 = vpop.f32.mrb[7].mxu0 }
 0x2fa   :  { %vm2107_vm6 = vcmp.gt.f32.partialorder %v2422_v10, 0.0  ;;  %v2109_v18 = vmul.f32 0.2, %v2422_v10 }
 0x2fb   :  { %v2110_v19 = vsel %vm2106_vm5, %v2421_v7, %v2108_v14 }
 0x2fc   :  { %v2111_v20 = vsel %vm2107_vm6, %v2422_v10, %v2109_v18  ;;  %v2124_v21 = vmul.f32 %v2117_v13, %v2110_v19 }
 0x2fd   :  { %v2125_v22 = vmul.f32 %v2121_v16, %v2111_v20 }
 0x2ff   :  { %v2126_v24 = vadd.f32 %v2125_v22, %v2124_v21 }
 0x301   :  { %2127 = vadd.xlane.f32.xlu0 %v2126_v24 }
 0x38e   :  { %v2128_v26 = vpop.xlane.xlu0 %2127 }
 0x38f   :  { %v2136_v12 = vadd.f32 %v2413_v25, %v2128_v26 }
 0x391   :  { %v2414_v27 = vmul.f32 -1.442695, %v2136_v12 }
 0x393   :  { %2845 = vpow2.f32 %v2414_v27 }
 0x39d   :  { %v2846_v36 = vpop.eup %2845 }
 0x39e   :  { %v2140_v1 = vadd.f32 1.0, %v2846_v36 }
 0x3a0   :  { %2847 = vrcp.f32 %v2140_v1 }
 0x3aa   :  { %v2848_v29 = vpop.eup %2847 }
 0x3ab   :  { %2144 = vst.msk [vmem:[%s3079_s7] sm:$0xff] %vm2143_vm7, %v2848_v29 }
 0x3ac   :  { %2149 = vsyncpa [#allocation4], 1 }
 0x3ad   :  { %2150 = vsyncpa [#allocation6], 1 }

</bundles_post_ra>
